<compile_context>
chip_gen: v7x
topology: tpu7x:2x2x1
jax: 0.10.0
libtpu: 0.0.40
codegen_flags: <defaults>
</compile_context>

<pallas_src>
import math

import jax
import jax.numpy as jnp
from jax.experimental import pallas as pl
from jax.experimental.pallas import tpu as pltpu


# --------------------------------------------------------------------------------------
# Kernel
# --------------------------------------------------------------------------------------
def fusion_kernel(h_ref, d_ref, w1t_ref, b1_ref, w2_ref, o_ref):
    # h_ref / d_ref : (tm, D)  current row-tile of hidden / dy_emb
    # w1t_ref       : (D, D)   linear1.weight transposed (in, out), grid-resident
    # b1_ref        : (1, D)   linear1.bias (f32)
    # w2_ref        : (1, D)   linear2.weight row (f32)
    h_raw = h_ref[...]
    d_raw = d_ref[...]

    mm_dt = w1t_ref.dtype                     # matmul operand dtype (f32 or bf16)
    w1t = w1t_ref[...]
    b1 = b1_ref[...]
    w2 = w2_ref[...]

    # Two MXU matmuls against the same resident weight (no in-kernel concat:
    # saves the (2*tm, D) VMEM temp and its load/store-slot traffic).
    t_h = jnp.tanh(jnp.dot(h_raw.astype(mm_dt), w1t,
                           preferred_element_type=jnp.float32) + b1)
    t_d = jnp.tanh(jnp.dot(d_raw.astype(mm_dt), w1t,
                           preferred_element_type=jnp.float32) + b1)

    # linear2 (out=1) as a lane reduction -> per-row logits.  linear2.bias adds
    # equally to both branch logits and cancels in the 2-way softmax.
    s_h = jnp.sum(t_h * w2, axis=-1, keepdims=True)          # (tm, 1) f32
    s_d = jnp.sum(t_d * w2, axis=-1, keepdims=True)          # (tm, 1) f32

    # softmax over the 2 stacked branches == sigmoid of the logit difference
    # (exact; exp overflow/underflow saturates p to 0/1 correctly).
    p_h = 1.0 / (1.0 + jnp.exp(s_d - s_h))                   # (tm, 1) f32

    h = h_raw.astype(jnp.float32)
    d = d_raw.astype(jnp.float32)
    # p*h + (1-p)*d == d + p*(h - d): one fewer full-tile multiply.
    o_ref[...] = (d + p_h * (h - d)).astype(o_ref.dtype)


# --------------------------------------------------------------------------------------
# Host-side wrapper
# --------------------------------------------------------------------------------------
def _round_up(x, m):
    return ((x + m - 1) // m) * m


def _tpu_vmem_capacity_bytes():
    try:
        info = pltpu.get_tpu_info()
        cap = int(getattr(info, "vmem_capacity_bytes", 0))
        if cap > 0:
            return cap
    except Exception:
        pass
    return 64 << 20          # conservative fallback (v7x-sized VMEM)


def _tensorcores_per_chip():
    # Megacore chips (v4 / v5p / v7x) shard "parallel" grid axes across 2 TCs.
    try:
        kind = jax.devices()[0].device_kind.lower()
    except Exception:
        return 1
    if "lite" in kind or "v5e" in kind or "v6e" in kind:
        return 1
    if "v4" in kind or "v5p" in kind or "v7" in kind:
        return 2
    return 1


def fusion_forward(hidden, dy_emb, w1, b1, w2, b2=None, *, tm=1024,
                   bf16_matmul=False, single_buffer_weights=False):
    """hidden, dy_emb: (N, D).  w1: (D, D) (out, in), b1: (D,), w2: (1, D), b2: (1,).

    b2 is accepted for interface parity but cancels in the 2-way softmax.
    bf16_matmul: opt-in bf16 MXU path for f32 inputs (f32 accumulation).
    single_buffer_weights: opt-in pl.Buffered(1) on the grid-resident weights.
    """
    N, D = hidden.shape
    out_dtype = hidden.dtype

    in_dt = jnp.dtype(hidden.dtype)
    mm_dtype = jnp.bfloat16 if (bf16_matmul or in_dt == jnp.bfloat16) else in_dt

    in_item = in_dt.itemsize
    out_item = jnp.dtype(out_dtype).itemsize
    mm_item = jnp.dtype(mm_dtype).itemsize

    # --- generation-aware VMEM budget ------------------------------------------------
    vmem_cap = _tpu_vmem_capacity_bytes()         # 64 MiB on v7x, 128 MiB on v5e/v6e
    budget = max(32 << 20, int(vmem_cap * 0.75))  # ~48 MiB v7x, ~96 MiB v5e/v6e

    # VMEM tiles are laid out in (8, 128) tiles -> footprint estimate uses the
    # lane/sublane-rounded sizes even though HBM arrays stay unpadded.
    Dl = _round_up(D, 128)
    w_bufs = 1 if single_buffer_weights else 2    # constant-index blocks still 2-buffer
    weight_bytes = w_bufs * (Dl * Dl * mm_item + 2 * Dl * 4)

    def est_vmem(tm_):
        tm_r = _round_up(tm_, 8)
        io = 2 * (2 * tm_r * Dl * in_item) + 2 * tm_r * Dl * out_item  # 2 in + 1 out, x2 bufs
        temps = 2 * tm_r * Dl * 8                                      # f32 tanh outs + f32 casts
        if mm_item < in_item:
            temps += 2 * tm_r * Dl * mm_item                           # bf16 operand casts
        return io + weight_bytes + temps

    # --- row-tile selection -----------------------------------------------------------
    n_cores = _tensorcores_per_chip()
    target = max(8, (int(tm) // 8) * 8)
    if n_cores > 1:
        # keep >= 2 grid steps per TensorCore so each core's DMA stays overlapped
        steps_needed = 2 * n_cores
        if N >= steps_needed * 8:
            target = min(target, max(8, (N // steps_needed // 8) * 8))
    # never allocate a tile larger than the (sublane-rounded) problem
    target = min(target, _round_up(N, 8))

    tm_eff = max(8, target)
    while tm_eff > 8 and est_vmem(tm_eff) > budget:
        tm_eff = max(8, ((tm_eff // 2) // 8) * 8)
    # TODO(synk): if D is so large that the resident (D, D) weight alone exceeds the
    # budget (D >~ 3-4K on v7x), add a K/N grid axis over W1 with an f32 accumulator
    # instead of shrinking tm further.

    grid = (pl.cdiv(N, tm_eff),)
    vmem_limit = int(min(max(int(est_vmem(tm_eff) * 1.25), 32 << 20), budget))

    # --- host-side layout prep (no padding / slicing -> no extra HBM passes) ----------
    w1t = jnp.transpose(w1).astype(mm_dtype)                  # (in, out)
    b1_2d = b1.reshape(1, D).astype(jnp.float32)
    w2_2d = w2.reshape(1, D).astype(jnp.float32)

    def _weight_spec(shape):
        if single_buffer_weights:
            # Single-buffer the grid-resident weights (halves their VMEM footprint;
            # matters for large D on v7x's 64 MiB VMEM).
            # TODO(synk): enable by default once pl.Buffered(1) plumbing is validated
            # on the deployment jax version.
            return pl.BlockSpec(shape, lambda i: (0, 0), pipeline_mode=pl.Buffered(1))
        return pl.BlockSpec(shape, lambda i: (0, 0))

    out = pl.pallas_call(
        fusion_kernel,
        out_shape=jax.ShapeDtypeStruct((N, D), out_dtype),
        grid_spec=pltpu.PrefetchScalarGridSpec(
            num_scalar_prefetch=0,
            grid=grid,
            in_specs=[
                pl.BlockSpec((tm_eff, D), lambda i: (i, 0)),   # hidden row-tile
                pl.BlockSpec((tm_eff, D), lambda i: (i, 0)),   # dy_emb row-tile
                _weight_spec((D, D)),                          # W1^T (grid-resident)
                _weight_spec((1, D)),                          # b1
                _weight_spec((1, D)),                          # W2 row
            ],
            out_specs=pl.BlockSpec((tm_eff, D), lambda i: (i, 0)),
        ),
        compiler_params=pltpu.CompilerParams(
            dimension_semantics=("parallel",),
            vmem_limit_bytes=vmem_limit,
        ),
    )(hidden, dy_emb, w1t, b1_2d, w2_2d)

    return out


# --------------------------------------------------------------------------------------
# Reference + test
# --------------------------------------------------------------------------------------
def reference_forward(hidden, dy_emb, w1, b1, w2, b2):
    emb = jnp.stack([hidden, dy_emb], axis=0)                 # (2, N, D)
    h1 = jnp.tanh(emb @ w1.T + b1)                            # (2, N, D)
    logits = h1 @ w2.T + b2                                   # (2, N, 1)
    score = jax.nn.softmax(logits, axis=0)
    return jnp.sum(score * emb, axis=0)


def xavier_normal(key, shape):
    # shape = (fan_out, fan_in), matching torch.nn.Linear.weight
    fan_out, fan_in = shape
    std = math.sqrt(2.0 / (fan_in + fan_out))
    return std * jax.random.normal(key, shape, dtype=jnp.float32)


def _make_params(key, D):
    k_w1, k_w2, k_b1, k_b2 = jax.random.split(key, 4)
    w1 = xavier_normal(k_w1, (D, D))                           # linear1.weight
    b1 = jax.random.uniform(k_b1, (D,), minval=-1.0 / math.sqrt(D),
                            maxval=1.0 / math.sqrt(D), dtype=jnp.float32)
    w2 = xavier_normal(k_w2, (1, D))                           # linear2.weight
    b2 = jax.random.uniform(k_b2, (1,), minval=-1.0 / math.sqrt(D),
                            maxval=1.0 / math.sqrt(D), dtype=jnp.float32)
    return w1, b1, w2, b2


if __name__ == "__main__":
    key = jax.random.PRNGKey(0)

    # ---- test 1: small module-like shapes, f32 path ---------------------------------
    N, D = 16, 32          # user_count, embedding_dim
    k_in, k_par, key = jax.random.split(key, 3)
    k_h, k_d = jax.random.split(k_in)
    hidden = jax.random.normal(k_h, (N, D), dtype=jnp.float32)
    dy_emb = jax.random.normal(k_d, (N, D), dtype=jnp.float32)
    w1, b1, w2, b2 = _make_params(k_par, D)

    out = jax.block_until_ready(fusion_forward(hidden, dy_emb, w1, b1, w2, b2))
    ref = reference_forward(hidden, dy_emb, w1, b1, w2, b2)
    assert out.shape == (N, D)
    assert jnp.allclose(out, ref, atol=1e-5, rtol=1e-5), "f32 path mismatch"

    # ---- test 2: ragged rows + non-multiple-of-128 feature dim + multi-step grid -----
    N2, D2 = 100, 96
    k_in2, k_par2, key = jax.random.split(key, 3)
    k_h2, k_d2 = jax.random.split(k_in2)
    hidden2 = jax.random.normal(k_h2, (N2, D2), dtype=jnp.float32)
    dy_emb2 = jax.random.normal(k_d2, (N2, D2), dtype=jnp.float32)
    w1_2, b1_2, w2_2, b2_2 = _make_params(k_par2, D2)

    out2 = jax.block_until_ready(
        fusion_forward(hidden2, dy_emb2, w1_2, b1_2, w2_2, b2_2, tm=32))
    ref2 = reference_forward(hidden2, dy_emb2, w1_2, b1_2, w2_2, b2_2)
    assert out2.shape == (N2, D2)
    assert jnp.allclose(out2, ref2, atol=1e-3, rtol=1e-3), "ragged-grid path mismatch"

    # ---- test 3: opt-in bf16 matmul path (looser tolerance vs f32 reference) ---------
    out_bf16 = jax.block_until_ready(
        fusion_forward(hidden, dy_emb, w1, b1, w2, b2, bf16_matmul=True))
    assert jnp.allclose(out_bf16, ref, atol=5e-2, rtol=5e-2), "bf16 path mismatch"

    # TODO(synk): nn.Dropout on emb_score is identity in eval mode; training-mode
    # stochastic dropout (pltpu.prng_seed / prng_random_bits) not implemented here.
    print("KERNEL_OK")
</pallas_src>

<mosaic_0001>
module attributes {stable_mosaic.version = 11 : i64} {
  func.func @fusion_kernel(%arg0: i32, %arg1: memref<16x32xf32, #tpu.memory_space<vmem>>, %arg2: memref<16x32xf32, #tpu.memory_space<vmem>>, %arg3: memref<32x32xf32, #tpu.memory_space<vmem>>, %arg4: memref<1x32xf32, #tpu.memory_space<vmem>>, %arg5: memref<1x32xf32, #tpu.memory_space<vmem>>, %arg6: memref<16x32xf32, #tpu.memory_space<vmem>>) attributes {dimension_semantics = [#tpu.dimension_semantics<parallel>], iteration_bounds = array<i64: 1>, scalar_prefetch = 0 : i64, scratch_operands = 0 : i64, tpu.core_type = #tpu.core_type<tc>, window_params = [{transform_indices = @transform_0, window_bounds = array<i64: 16, 32>}, {transform_indices = @transform_1, window_bounds = array<i64: 16, 32>}, {pipeline_mode = #tpu.pipeline_mode<synchronous>, transform_indices = @transform_2, window_bounds = array<i64: 32, 32>}, {pipeline_mode = #tpu.pipeline_mode<synchronous>, transform_indices = @transform_3, window_bounds = array<i64: 1, 32>}, {pipeline_mode = #tpu.pipeline_mode<synchronous>, transform_indices = @transform_4, window_bounds = array<i64: 1, 32>}, {transform_indices = @transform_5, window_bounds = array<i64: 16, 32>}]} {
    %c0 = arith.constant 0 : index
    %c0_0 = arith.constant 0 : index
    %0 = vector.load %arg1[%c0, %c0_0] : memref<16x32xf32, #tpu.memory_space<vmem>>, vector<16x32xf32>
    %c0_1 = arith.constant 0 : index
    %c0_2 = arith.constant 0 : index
    %1 = vector.load %arg2[%c0_1, %c0_2] : memref<16x32xf32, #tpu.memory_space<vmem>>, vector<16x32xf32>
    %c0_3 = arith.constant 0 : index
    %c0_4 = arith.constant 0 : index
    %2 = vector.load %arg3[%c0_3, %c0_4] : memref<32x32xf32, #tpu.memory_space<vmem>>, vector<32x32xf32>
    %c0_5 = arith.constant 0 : index
    %c0_6 = arith.constant 0 : index
    %3 = vector.load %arg4[%c0_5, %c0_6] : memref<1x32xf32, #tpu.memory_space<vmem>>, vector<1x32xf32>
    %c0_7 = arith.constant 0 : index
    %c0_8 = arith.constant 0 : index
    %4 = vector.load %arg5[%c0_7, %c0_8] : memref<1x32xf32, #tpu.memory_space<vmem>>, vector<1x32xf32>
    %cst = arith.constant dense<0.000000e+00> : vector<16x32xf32>
    %5 = tpu.matmul %0, %2, %cst {dimension_numbers = #tpu.dot_dimension_numbers<[1], [0], [0], [1], [0, 0, 1, 1], [], []>} : vector<16x32xf32>, vector<32x32xf32>, vector<16x32xf32> -> vector<16x32xf32>
    %6 = vector.broadcast %3 : vector<1x32xf32> to vector<16x32xf32>
    %7 = arith.addf %5, %6 : vector<16x32xf32>
    %8 = math.tanh %7 : vector<16x32xf32>
    %cst_9 = arith.constant dense<0.000000e+00> : vector<16x32xf32>
    %9 = tpu.matmul %1, %2, %cst_9 {dimension_numbers = #tpu.dot_dimension_numbers<[1], [0], [0], [1], [0, 0, 1, 1], [], []>} : vector<16x32xf32>, vector<32x32xf32>, vector<16x32xf32> -> vector<16x32xf32>
    %10 = vector.broadcast %3 : vector<1x32xf32> to vector<16x32xf32>
    %11 = arith.addf %9, %10 : vector<16x32xf32>
    %12 = math.tanh %11 : vector<16x32xf32>
    %13 = vector.broadcast %4 : vector<1x32xf32> to vector<16x32xf32>
    %14 = arith.mulf %8, %13 : vector<16x32xf32>
    %cst_10 = arith.constant dense<0.000000e+00> : vector<16xf32>
    %15 = vector.multi_reduction <add>, %14, %cst_10 [1] : vector<16x32xf32> to vector<16xf32>
    %16 = vector.shape_cast %15 : vector<16xf32> to vector<16x1xf32>
    %17 = vector.broadcast %4 : vector<1x32xf32> to vector<16x32xf32>
    %18 = arith.mulf %12, %17 : vector<16x32xf32>
    %cst_11 = arith.constant dense<0.000000e+00> : vector<16xf32>
    %19 = vector.multi_reduction <add>, %18, %cst_11 [1] : vector<16x32xf32> to vector<16xf32>
    %20 = vector.shape_cast %19 : vector<16xf32> to vector<16x1xf32>
    %21 = arith.subf %20, %16 : vector<16x1xf32>
    %22 = math.exp %21 : vector<16x1xf32>
    %cst_12 = arith.constant 1.000000e+00 : f32
    %23 = vector.broadcast %cst_12 : f32 to vector<16x1xf32>
    %24 = arith.addf %23, %22 : vector<16x1xf32>
    %cst_13 = arith.constant 1.000000e+00 : f32
    %25 = vector.broadcast %cst_13 : f32 to vector<16x1xf32>
    %26 = arith.divf %25, %24 : vector<16x1xf32>
    %27 = arith.subf %0, %1 : vector<16x32xf32>
    %28 = vector.broadcast %26 : vector<16x1xf32> to vector<16x32xf32>
    %29 = arith.mulf %28, %27 : vector<16x32xf32>
    %30 = arith.addf %1, %29 : vector<16x32xf32>
    %c0_14 = arith.constant 0 : index
    %c0_15 = arith.constant 0 : index
    %31 = vector.load %arg6[%c0_14, %c0_15] : memref<16x32xf32, #tpu.memory_space<vmem>>, vector<16x32xf32>
    tpu.vector_store %arg6[%c0_14, %c0_15], %30 {strides = array<i32>} : memref<16x32xf32, #tpu.memory_space<vmem>>, vector<16x32xf32>,
    return
  }
  func.func @transform_0(%arg0: i32) -> (i32, i32) {
    %c0_i32 = arith.constant 0 : i32
    %c0_i32_0 = arith.constant 0 : i32
    return %arg0, %c0_i32 : i32, i32
  }
  func.func @transform_1(%arg0: i32) -> (i32, i32) {
    %c0_i32 = arith.constant 0 : i32
    %c0_i32_0 = arith.constant 0 : i32
    return %arg0, %c0_i32 : i32, i32
  }
  func.func @transform_2(%arg0: i32) -> (i32, i32) {
    %c0_i32 = arith.constant 0 : i32
    %c0_i32_0 = arith.constant 0 : i32
    %c0_i32_1 = arith.constant 0 : i32
    return %c0_i32, %c0_i32_0 : i32, i32
  }
  func.func @transform_3(%arg0: i32) -> (i32, i32) {
    %c0_i32 = arith.constant 0 : i32
    %c0_i32_0 = arith.constant 0 : i32
    %c0_i32_1 = arith.constant 0 : i32
    return %c0_i32, %c0_i32_0 : i32, i32
  }
  func.func @transform_4(%arg0: i32) -> (i32, i32) {
    %c0_i32 = arith.constant 0 : i32
    %c0_i32_0 = arith.constant 0 : i32
    %c0_i32_1 = arith.constant 0 : i32
    return %c0_i32, %c0_i32_0 : i32, i32
  }
  func.func @transform_5(%arg0: i32) -> (i32, i32) {
    %c0_i32 = arith.constant 0 : i32
    %c0_i32_0 = arith.constant 0 : i32
    return %arg0, %c0_i32 : i32, i32
  }
}

</mosaic_0001>

<bundles_post_ra>
// kernel: tpu_custom_call.1
= control target key start
LH: loop header
LB: loop body
LE: loop exit
PB: predicated region body
PF: predicated region fallthrough
CT: control target
= control target key end

     0   :  { %10 = vsyncpa [#allocation3], 0  ;;  %s605_s0 = inlined_call_operand.hbm [shape: f32[16,32], index: 0, kind: input, shape index: {}]   ;;  %s606_s1 = inlined_call_operand.hbm [shape: f32[16,32], index: 1, kind: input, shape index: {}]   ;;  %s607_s2 = inlined_call_operand.hbm [shape: f32[32,32], index: 2, kind: input, shape index: {}]   ;;  %s608_s3 = inlined_call_operand.vmem [shape: f32[1,32], index: 3, kind: input, shape index: {}]   ;;  %s609_s4 = inlined_call_operand.vmem [shape: f32[1,32], index: 4, kind: input, shape index: {}]   ;;  %s610_s5 = inlined_call_operand.hbm [shape: f32[16,32], index: 5, kind: output, shape index: {}]  }
   0x1   :  { %11 = vsyncpa [#allocation6], 0 }
   0x2   :  { %12 = vsyncpa [#allocation4], 0  ;;  %s477_s18 = smov [#allocation5]   ;;  %s478_s20 = smov [#allocation2]  }
   0x3   :  { %s30_s19 = sshll.u32 %s477_s18, 4  ;;  %s18_s21 = sshll.u32 %s478_s20, 4  ;;  %s31_s19 = int_to_ptr.vmem [resolvable:$true] %s30_s19  ;;  %s513_s21 = int_to_ptr.vmem [resolvable:$true] %s18_s21 }
   0x4   :  { %s383_s24 = scalar_lea.hbm %s606_s1, 256 }
   0x5   :  { %p384_p0 = scmp.ne.s32.totalorder %s606_s1, %s383_s24  ;;  %p387_p1 = scmp.lt.u32.totalorder %s383_s24, %s606_s1 }
   0x7   :  { %p389_p2 = pnand %p387_p1, %p384_p0 }
   0x9   :  { %392 = shalt.err (!%p389_p2)
}
   0xa   :  { %s393_s29 = scalar_lea.vmem %s31_s19, 256  ;;  %p398_p4 = scmp.lt.s32.totalorder %s31_s19, %s31_s19 }
   0xb   :  { %p394_p3 = scmp.ne.s32.totalorder %s31_s19, %s393_s29  ;;  %p399_p5 = scmp.lt.s32.totalorder %s393_s29, %s393_s29 }
   0xd   :  { %p400_p6 = por %p399_p5, %p398_p4 }
   0xf   :  { %p401_p7 = pnand %p400_p6, %p394_p3 }
  0x11   :  { %404 = shalt.err (!%p401_p7)
}
  0x12   :  { %s479_s30 = smov 128   ;;  %s480_s6 = smov 8  }
  0x13   :  { %36 = dma.hbm_to_vmem [thread:$0]  %s606_s1, 256, %s31_s19, [#allocation6], %s479_s30, %s479_s30, %s480_s6  }
  0x14   :  { %s405_s11 = scalar_lea.hbm %s605_s0, 256 }
  0x15   :  { %p406_p8 = scmp.ne.s32.totalorder %s605_s0, %s405_s11  ;;  %p409_p9 = scmp.lt.u32.totalorder %s405_s11, %s605_s0 }
  0x17   :  { %p411_p10 = pnand %p409_p9, %p406_p8 }
  0x19   :  { %414 = shalt.err (!%p411_p10)
}
  0x1a   :  { %s415_s16 = scalar_lea.vmem %s513_s21, 256  ;;  %p420_p12 = scmp.lt.s32.totalorder %s513_s21, %s513_s21 }
  0x1b   :  { %p416_p11 = scmp.ne.s32.totalorder %s513_s21, %s415_s16  ;;  %p421_p13 = scmp.lt.s32.totalorder %s415_s16, %s415_s16 }
  0x1d   :  { %p422_p0 = por %p421_p13, %p420_p12 }
  0x1f   :  { %p423_p1 = pnand %p422_p0, %p416_p11 }
  0x21   :  { %426 = shalt.err (!%p423_p1)
}
  0x22   :  { %24 = dma.hbm_to_vmem [thread:$0]  %s605_s0, 256, %s513_s21, [#allocation3], %s479_s30, %s479_s30, %s480_s6  }
  0x23   :  { %s481_s18 = smov [#allocation7]   ;;  %s427_s23 = scalar_lea.hbm %s607_s2, 512 }
  0x24   :  { %s42_s19 = sshll.u32 %s481_s18, 4  ;;  %p428_p2 = scmp.ne.s32.totalorder %s607_s2, %s427_s23  ;;  %s43_s19 = int_to_ptr.vmem [resolvable:$true] %s42_s19 }
  0x25   :  { %p431_p3 = scmp.lt.u32.totalorder %s427_s23, %s607_s2 }
  0x27   :  { %p433_p4 = pnand %p431_p3, %p428_p2 }
  0x29   :  { %436 = shalt.err (!%p433_p4)
}
  0x2a   :  { %s437_s28 = scalar_lea.vmem %s43_s19, 512  ;;  %p442_p6 = scmp.lt.s32.totalorder %s43_s19, %s43_s19 }
  0x2b   :  { %p438_p5 = scmp.ne.s32.totalorder %s43_s19, %s437_s28  ;;  %p443_p7 = scmp.lt.s32.totalorder %s437_s28, %s437_s28 }
  0x2d   :  { %p444_p8 = por %p443_p7, %p442_p6 }
  0x2f   :  { %p445_p9 = pnand %p444_p8, %p438_p5 }
  0x31   :  { %448 = shalt.err (!%p445_p9)
}
  0x32   :  { %48 = dma.hbm_to_vmem [thread:$0]  %s607_s2, 512, %s43_s19, [#allocation6], %s479_s30, %s479_s30, %s480_s6  }
  0x33   :  { %471 = dma.done.wait [#allocation3], 256  }
  0x34   :  { %472 = vsyncadd [#allocation3], 4294967040 }
  0x35   :  { %473 = dma.done.wait [#allocation6], 768  }
  0x36   :  { %474 = vsyncadd [#allocation6], 4294966528  ;;  %vm78_vm0 = vcmask 261120   ;;  %v66_v0 = vld [vmem:[#allocation7] sm:$0xff]  ;;  %v67_v1 = vld [vmem:[#allocation7 + $0x8] sm:$0xff] }
  0x37   :  { %v68_v2 = vld [vmem:[#allocation7 + $0x10] sm:$0xff]  ;;  %v345_v3 = vpack.c.bf16 %v67_v1, %v66_v0  ;;  %v69_v4 = vld [vmem:[#allocation7 + $0x18] sm:$0xff]  ;;  %v565_v5 = vld [vmem:[#allocation2] sm:$0xff] }
  0x38   :  { %v567_v6 = vld [vmem:[#allocation5] sm:$0xff]  ;;  %v349_v7 = vpack.c.bf16 %v69_v4, %v68_v2  ;;  %331 = vmatprep.mubr.msk.f32.mxu0 %vm78_vm0, %v565_v5  ;;  %v63_v8 = vld [vmem:[#allocation2 + $0x8] sm:$0xff]  ;;  %v65_v9 = vld [vmem:[#allocation5 + $0x8] sm:$0xff] }
  0x39   :  { %342 = vmatprep.mubr.msk.f32.mxu1 %vm78_vm0, %v567_v6  ;;  %346 = vmatprep.subr.bf16.mxu0 %v345_v3  ;;  %v305_v10 = vld [vmem:[%s608_s3] ss:$0 sm:$0xff]  ;;  %v279_v44 = vsub.f32 %v565_v5, %v567_v6  ;;  %v280_v46 = vsub.f32 %v63_v8, %v65_v9  ;;  %s482_s3 = smov [#allocation8]  }
  0x3a   :  { %354 = vmatprep.subr.bf16.mxu1 %v345_v3  ;;  %348 = vmatpush3.bf16.msra.mxu0 %v345_v3  ;;  %v310_v20 = vld [vmem:[%s609_s4] ss:$0 sm:$0xff]  ;;  %s292_s4 = sshll.u32 %s482_s3, 4  ;;  %s293_s4 = int_to_ptr.vmem [resolvable:$true] %s292_s4 }
  0x3b   :  { %356 = vmatpush3.bf16.msra.mxu1 %v345_v3  ;;  %350 = vmatprep.subr.bf16.mxu0 %v349_v7  ;;  %s449_s9 = scalar_lea.vmem %s293_s4, 256  ;;  %p454_p11 = scmp.lt.s32.totalorder %s293_s4, %s293_s4 }
  0x3c   :  { %358 = vmatprep.subr.bf16.mxu1 %v349_v7  ;;  %p450_p10 = scmp.ne.s32.totalorder %s293_s4, %s449_s9  ;;  %p455_p12 = scmp.lt.s32.totalorder %s449_s9, %s449_s9 }
  0x3e   :  { %352 = vmatpush3.bf16.msra.mxu0 %v349_v7  ;;  %p456_p13 = por %p455_p12, %p454_p11 }
  0x3f   :  { %360 = vmatpush3.bf16.msra.mxu1 %v349_v7 }
  0x40   :  { %p457_p0 = pnand %p456_p13, %p450_p10 }
  0x41   :  { %332 = vmatmul.mubr.msk.f32.vlgmr.msra.gmra.mrb[0].mxu0 %vm78_vm0, %v63_v8 }
  0x42   :  { %343 = vmatmul.mubr.msk.f32.vlgmr.msra.gmra.mrb[0].mxu1 %vm78_vm0, %v65_v9 }
 0x114   :  { %v333_v11 = vpop.f32.mrb[0].mxu0 }
 0x115   :  { %v344_v12 = vpop.f32.mrb[0].mxu1  ;;  %v157_v13 = vadd.f32 %v333_v11, %v305_v10  ;;  %v151_v15 = vpop.f32.mrb[1].mxu0 }
 0x116   :  { %v240_v14 = vadd.f32 %v344_v12, %v305_v10  ;;  %v234_v16 = vpop.f32.mrb[1].mxu1  ;;  %v152_v17 = vadd.f32 %v305_v10, %v151_v15 }
 0x117   :  { %v235_v18 = vadd.f32 %v305_v10, %v234_v16  ;;  %367 = vtanh.f32 %v157_v13 }
 0x118   :  { %369 = vtanh.f32 %v240_v14 }
 0x119   :  { %371 = vtanh.f32 %v152_v17 }
 0x11a   :  { %373 = vtanh.f32 %v235_v18 }
 0x121   :  { %v368_v19 = vpop.eup %367 }
 0x122   :  { %v370_v21 = vpop.eup %369  ;;  %v252_v27 = vmul.f32 %v368_v19, %v310_v20 }
 0x123   :  { %v372_v22 = vpop.eup %371  ;;  %v260_v29 = vmul.f32 %v370_v21, %v310_v20 }
 0x124   :  { %v374_v23 = vpop.eup %373  ;;  %v251_v24 = vmul.f32 %v372_v22, %v310_v20  ;;  %v256_v30 = vsel %vm78_vm0, %v252_v27, 0.0 }
 0x125   :  { %v259_v25 = vmul.f32 %v374_v23, %v310_v20  ;;  %v264_v31 = vsel %vm78_vm0, %v260_v29, 0.0 }
 0x126   :  { %v253_v26 = vsel %vm78_vm0, %v251_v24, 0.0 }
 0x127   :  { %v261_v28 = vsel %vm78_vm0, %v259_v25, 0.0  ;;  %254 = vadd.xlane.f32.xlu0 %v253_v26 }
 0x128   :  { %262 = vadd.xlane.f32.xlu1 %v261_v28 }
 0x12b   :  { %257 = vadd.xlane.f32.xlu0 %v256_v30 }
 0x12c   :  { %265 = vadd.xlane.f32.xlu1 %v264_v31 }
 0x1b4   :  { %v255_v32 = vpop.xlane.xlu0 %254 }
 0x1b5   :  { %v263_v33 = vpop.xlane.xlu1 %262 }
 0x1b6   :  { %v267_v34 = vsub.f32 %v263_v33, %v255_v32 }
 0x1b8   :  { %v269_v35 = vmul.f32 1.442695, %v267_v34  ;;  %v258_v36 = vpop.xlane.xlu0 %257 }
 0x1b9   :  { %v266_v37 = vpop.xlane.xlu1 %265 }
 0x1ba   :  { %375 = vpow2.f32 %v269_v35  ;;  %v268_v38 = vsub.f32 %v266_v37, %v258_v36 }
 0x1bc   :  { %v271_v39 = vmul.f32 1.442695, %v268_v38 }
 0x1be   :  { %377 = vpow2.f32 %v271_v39 }
 0x1c4   :  { %v376_v40 = vpop.eup %375 }
 0x1c5   :  { %v273_v41 = vadd.f32 1.0, %v376_v40 }
 0x1c7   :  { %379 = vrcp.f32 %v273_v41 }
 0x1c8   :  { %v378_v42 = vpop.eup %377 }
 0x1c9   :  { %v274_v43 = vadd.f32 1.0, %v378_v42 }
 0x1cb   :  { %381 = vrcp.f32 %v274_v43 }
 0x1d1   :  { %v380_v45 = vpop.eup %379 }
 0x1d2   :  { %v281_v47 = vmul.f32 %v380_v45, %v279_v44 }
 0x1d4   :  { %v283_v48 = vadd.f32 %v281_v47, %v567_v6 }
 0x1d5   :  { %v382_v49 = vpop.eup %381 }
 0x1d6   :  { %v282_v50 = vmul.f32 %v382_v49, %v280_v46  ;;  %285 = vst.msk [vmem:[#allocation8] sm:$0xff] %vm78_vm0, %v283_v48 }
 0x1d8   :  { %v284_v51 = vadd.f32 %v282_v50, %v65_v9 }
 0x1da   :  { %286 = vst.msk [vmem:[#allocation8 + $0x8] sm:$0xff] %vm78_vm0, %v284_v51 }
 0x1db   :  { %460 = shalt.err (!%p457_p0)
}
 0x1dc   :  { %s461_s12 = scalar_lea.hbm %s610_s5, 256 }
 0x1dd   :  { %p462_p1 = scmp.ne.s32.totalorder %s610_s5, %s461_s12  ;;  %p465_p2 = scmp.lt.u32.totalorder %s461_s12, %s610_s5 }
 0x1df   :  { %p467_p3 = pnand %p465_p2, %p462_p1 }
 0x1e1   :  { %470 = shalt.err (!%p467_p3)
}
 0x1e2   :  { %298 = dma.vmem_to_hbm [thread:$0]  %s293_s4, 256, %s610_s5, [#allocation4], %s479_s30, %s479_s30, %s480_s6  }
 0x1e3   :  { %475 = dma.done.wait [#allocation4], 256  }
 0x1e4   :  { %476 = vsyncadd [#allocation4], 4294967040 }
 0x1e5   :  { %302 = vsyncpa [#allocation3], 1 }
 0x1e6   :  { %303 = vsyncpa [#allocation6], 1 }
 0x1e7   :  { %304 = vsyncpa [#allocation4], 1 }

</bundles_post_ra>
